<compile_context>
chip_gen: v7x
topology: tpu7x:2x2x1
jax: 0.10.0
libtpu: 0.0.40
codegen_flags: <defaults>
</compile_context>

<pallas_src>
import jax
import jax.numpy as jnp
from jax.experimental import pallas as pl
from jax.experimental.pallas import tpu as pltpu


def _round_up(n, m):
    return ((n + m - 1) // m) * m


def _vmem_limit(estimate_bytes):
    # 2x margin over the static estimate, clamped to [32 MiB, 64 MiB]
    # (64 MiB keeps the limit valid on v7x; v5e/v6e have 128 MiB physical).
    return int(min(max(2 * estimate_bytes, 32 << 20), 64 << 20))


# ---------------------------------------------------------------------------
# Training kernel: disjoint-channel matmuls + bias, per-tile JS partial sums.
# Batch axis is "parallel": every tile writes its own out_s / out_t block and
# its own (8,128) js-partial block (scalar broadcast), no cross-tile state.
# ---------------------------------------------------------------------------
def _train_matmul_js_kernel(xs_ref, xt_ref, ws_ref, wt_ref, b_ref,
                            os_ref, ot_ref, jsp_ref):
    bias = b_ref[...].astype(jnp.float32)

    # Two disjoint-channel matmuls: total MXU work equals ONE full-K matmul.
    out_s = jnp.dot(xs_ref[...], ws_ref[...],
                    preferred_element_type=jnp.float32) + bias
    out_t = jnp.dot(xt_ref[...], wt_ref[...],
                    preferred_element_type=jnp.float32) + bias

    os_ref[...] = out_s.astype(os_ref.dtype)
    ot_ref[...] = out_t.astype(ot_ref.dtype)

    # log-softmax over the output (last) dim, reusing exp() for the probs.
    # pl.reciprocal(approx=True) runs on the EUP slot (near-free); it biases
    # p/q by ~2^-12 relative -> loose (1e-2) tolerance on the JS-scaled path.
    def _logsoftmax_and_probs(z):
        m = jnp.max(z, axis=-1, keepdims=True)
        s = z - m
        e = jnp.exp(s)
        se = jnp.sum(e, axis=-1, keepdims=True)
        p = e * pl.reciprocal(se, approx=True)
        return s - jnp.log(se), p

    log_p, p = _logsoftmax_and_probs(out_s)
    log_q, q = _logsoftmax_and_probs(out_t)

    # pm + qm folded:  js = sum((p - q) * (log_p - log_q)) / (4 * batch)
    tile_sum = jnp.sum((p - q) * (log_p - log_q), keepdims=True)   # (1, 1)
    jsp_ref[...] = jnp.broadcast_to(tile_sum, jsp_ref.shape)       # (8, 128)


# ---------------------------------------------------------------------------
# Eval kernel: plain tiled linear (weights resident & single-buffered).
# ---------------------------------------------------------------------------
def _eval_matmul_kernel(x_ref, w_ref, b_ref, o_ref):
    out = jnp.dot(x_ref[...], w_ref[...],
                  preferred_element_type=jnp.float32) + b_ref[...].astype(jnp.float32)
    o_ref[...] = out.astype(o_ref.dtype)


class LinearRFwJSDPallas:
    """Pallas TPU forward for Linear_RFwJSD.

    Weight is stored pre-transposed as [in_channels, out_channels]; bias as
    [1, out_channels]. Precondition (same as PyTorch ref): 0 < division_rate < 1
    and 0 < int(in_channels * division_rate) < in_channels.
    """

    def __init__(self, in_channels, out_channels, division_rate, key,
                 param_dtype=jnp.float32):
        self.in_channels = in_channels
        self.out_channels = out_channels
        self.division_rate = float(division_rate)
        kw, kb = jax.random.split(key)
        bound = 1.0 / (in_channels ** 0.5)
        # Same distribution as nn.Linear's default init.
        self.w_t = jax.random.uniform(kw, (in_channels, out_channels),
                                      jnp.float32, -bound, bound).astype(param_dtype)
        self.b = jax.random.uniform(kb, (1, out_channels),
                                    jnp.float32, -bound, bound).astype(param_dtype)

    # ---- tiling helper: batch tile (multiple of 8), low padding waste, and
    #      >=2 tiles when possible so both v7x TensorCores get work. ----
    @staticmethod
    def _batch_tiling(batch, max_tile):
        n_tiles = max(-(-batch // max_tile), 1)
        if batch >= 16:
            n_tiles = max(n_tiles, 2)
        tm = _round_up(-(-batch // n_tiles), 8)
        bp = _round_up(batch, tm)
        return tm, bp

    # ------------------------------ eval path ------------------------------
    def _eval_forward(self, x):
        batch = x.shape[0]
        k, n = self.in_channels, self.out_channels
        tm, bp = self._batch_tiling(batch, max_tile=256)
        xp = jnp.pad(x, ((0, bp - batch), (0, 0))) if bp != batch else x

        itemsize = jnp.dtype(self.w_t.dtype).itemsize
        est = (k * n * itemsize + n * itemsize              # single-buffered w, b
               + 2 * tm * k * x.dtype.itemsize              # double-buffered x
               + 2 * tm * n * x.dtype.itemsize              # double-buffered out
               + 2 * tm * n * 4)                            # f32 temporaries
        out = pl.pallas_call(
            _eval_matmul_kernel,
            out_shape=jax.ShapeDtypeStruct((bp, n), x.dtype),
            grid=(bp // tm,),
            in_specs=[
                pl.BlockSpec((tm, k), lambda i: (i, 0)),
                pl.BlockSpec((k, n), lambda i: (0, 0),
                             pipeline_mode=pl.Buffered(1)),
                pl.BlockSpec((1, n), lambda i: (0, 0),
                             pipeline_mode=pl.Buffered(1)),
            ],
            out_specs=pl.BlockSpec((tm, n), lambda i: (i, 0)),
            compiler_params=pltpu.CompilerParams(
                dimension_semantics=("parallel",),
                vmem_limit_bytes=_vmem_limit(est)),
        )(xp, self.w_t, self.b)
        return out[:batch]

    # ----------------------------- train path ------------------------------
    def _train_forward(self, x, mask_key):
        batch = x.shape[0]
        k, n = self.in_channels, self.out_channels

        # Deterministic "random" channel split (mirrors torch.randperm): the
        # first division_idx entries of the permutation are the 'throwed' set.
        division_idx = int(k * self.division_rate)
        assert 0 < division_idx < k, (
            "division_rate must leave both channel groups non-empty")
        rand_idx = jax.random.permutation(mask_key, k)

        # Permute ONCE per tensor, then take contiguous static slices: half the
        # gather work vs. four independent jnp.take calls.
        x_perm = jnp.take(x, rand_idx, axis=1)
        w_perm = jnp.take(self.w_t, rand_idx, axis=0)
        kt = division_idx
        ks = k - division_idx
        x_throwed, x_saved = x_perm[:, :kt], x_perm[:, kt:]
        w_throwed, w_saved = w_perm[:kt], w_perm[kt:]

        # Zero-pad both K groups to multiples of 128 (lane-aligned x tiles,
        # unpadded MXU contraction). Zero x-cols / zero w-rows contribute 0.
        ks_pad = _round_up(ks, 128)
        kt_pad = _round_up(kt, 128)

        tm, bp = self._batch_tiling(batch, max_tile=128)
        grid_m = bp // tm

        # Zero batch-pad rows give out_saved == out_throwed == bias -> exactly
        # zero contribution to the JS sum; the divisor uses the true batch.
        x_saved = jnp.pad(x_saved, ((0, bp - batch), (0, ks_pad - ks)))
        x_throwed = jnp.pad(x_throwed, ((0, bp - batch), (0, kt_pad - kt)))
        w_saved = jnp.pad(w_saved, ((0, ks_pad - ks), (0, 0)))
        w_throwed = jnp.pad(w_throwed, ((0, kt_pad - kt), (0, 0)))

        w_itemsize = jnp.dtype(self.w_t.dtype).itemsize
        x_itemsize = x.dtype.itemsize
        est = ((ks_pad + kt_pad) * n * w_itemsize + n * w_itemsize   # 1x weights/bias
               + 2 * tm * (ks_pad + kt_pad) * x_itemsize             # 2x x tiles
               + 2 * 2 * tm * n * x_itemsize + 2 * 8 * 128 * 4       # 2x out tiles
               + 8 * tm * n * 4)                                     # f32 temporaries

        out_s, out_t, jsp = pl.pallas_call(
            _train_matmul_js_kernel,
            out_shape=(
                jax.ShapeDtypeStruct((bp, n), x.dtype),
                jax.ShapeDtypeStruct((bp, n), x.dtype),
                jax.ShapeDtypeStruct((grid_m * 8, 128), jnp.float32),
            ),
            grid=(grid_m,),
            in_specs=[
                pl.BlockSpec((tm, ks_pad), lambda i: (i, 0)),
                pl.BlockSpec((tm, kt_pad), lambda i: (i, 0)),
                pl.BlockSpec((ks_pad, n), lambda i: (0, 0),
                             pipeline_mode=pl.Buffered(1)),
                pl.BlockSpec((kt_pad, n), lambda i: (0, 0),
                             pipeline_mode=pl.Buffered(1)),
                pl.BlockSpec((1, n), lambda i: (0, 0),
                             pipeline_mode=pl.Buffered(1)),
            ],
            out_specs=(
                pl.BlockSpec((tm, n), lambda i: (i, 0)),
                pl.BlockSpec((tm, n), lambda i: (i, 0)),
                pl.BlockSpec((8, 128), lambda i: (i, 0)),   # per-tile JS partials
            ),
            compiler_params=pltpu.CompilerParams(
                dimension_semantics=("parallel",),
                vmem_limit_bytes=_vmem_limit(est)),
        )(x_saved, x_throwed, w_saved, w_throwed, self.b)

        # Reduce the tiny per-tile partials and blend in plain JAX (XLA fuses
        # the scalar-scaled elementwise add with the un-pad slice / consumers).
        js = jnp.sum(jsp[::8, 0]) * (0.25 / batch)
        inv = 1.0 / (1.0 + js)                               # exact, one scalar
        out = (out_s.astype(jnp.float32) * (inv / (1.0 - self.division_rate)) +
               out_t.astype(jnp.float32) * (self.division_rate * js * inv))
        return out[:batch].astype(x.dtype)

    def __call__(self, x, *, training, mask_key=None):
        if training:
            assert mask_key is not None, "training mode needs a PRNG key"
            return self._train_forward(x, mask_key)
        return self._eval_forward(x)


# ---------------------------------------------------------------------------
# Pure-JAX reference (mirrors the PyTorch module) for a correctness check.
# ---------------------------------------------------------------------------
def _reference_train(x, w_t, b, throwed_idx, division_rate):
    k = x.shape[1]
    mask = jnp.zeros((k,), jnp.float32).at[throwed_idx].set(1.0)[None, :]
    x_thr = x * mask
    x_sav = x * (1.0 - mask)
    out_s = x_sav @ w_t + b
    out_t = x_thr @ w_t + b
    log_p = jax.nn.log_softmax(out_s, axis=1)
    log_q = jax.nn.log_softmax(out_t, axis=1)
    mixture = 0.5 * (log_p + log_q)
    batch = x.shape[0]
    pm = jnp.sum(jnp.exp(log_p) * (log_p - mixture)) / batch
    qm = jnp.sum(jnp.exp(log_q) * (log_q - mixture)) / batch
    js = 0.5 * (pm + qm)
    return (out_s / ((1.0 + js) * (1.0 - division_rate)) +
            out_t * division_rate * js / (1.0 + js))


if __name__ == "__main__":
    key = jax.random.PRNGKey(0)
    k_param, k_x, k_mask = jax.random.split(key, 3)

    batch, in_channels, out_channels = 8, 32, 32
    division_rate = 0.5

    mod = LinearRFwJSDPallas(in_channels, out_channels, division_rate, k_param)
    x = jax.random.normal(k_x, (batch, in_channels), jnp.float32)

    out_train = mod(x, training=True, mask_key=k_mask)
    out_eval = mod(x, training=False)
    jax.block_until_ready(out_train)
    jax.block_until_ready(out_eval)

    assert out_train.shape == (batch, out_channels)
    assert out_eval.shape == (batch, out_channels)

    # Correctness checks against the pure-JAX reference.
    rand_idx = jax.random.permutation(k_mask, in_channels)
    throwed_idx = rand_idx[: int(in_channels * division_rate)]
    ref_train = _reference_train(x, mod.w_t, mod.b, throwed_idx, division_rate)
    ref_eval = x @ mod.w_t + mod.b
    assert jnp.allclose(out_eval, ref_eval, rtol=1e-3, atol=1e-3)
    # approx reciprocal in the softmax/js path -> loose tolerance
    assert jnp.allclose(out_train, ref_train, rtol=1e-2, atol=1e-2)

    print("KERNEL_OK")
</pallas_src>

<mosaic_0001>
module attributes {stable_mosaic.version = 11 : i64} {
  func.func @_train_matmul_js_kernel(%arg0: i32, %arg1: memref<8x128xf32, #tpu.memory_space<vmem>>, %arg2: memref<8x128xf32, #tpu.memory_space<vmem>>, %arg3: memref<128x32xf32, #tpu.memory_space<vmem>>, %arg4: memref<128x32xf32, #tpu.memory_space<vmem>>, %arg5: memref<1x32xf32, #tpu.memory_space<vmem>>, %arg6: memref<8x32xf32, #tpu.memory_space<vmem>>, %arg7: memref<8x32xf32, #tpu.memory_space<vmem>>, %arg8: memref<8x128xf32, #tpu.memory_space<vmem>>) attributes {dimension_semantics = [#tpu.dimension_semantics<parallel>], iteration_bounds = array<i64: 1>, scalar_prefetch = 0 : i64, scratch_operands = 0 : i64, tpu.core_type = #tpu.core_type<tc>, window_params = [{transform_indices = @transform_0, window_bounds = array<i64: 8, 128>}, {transform_indices = @transform_1, window_bounds = array<i64: 8, 128>}, {pipeline_mode = #tpu.pipeline_mode<synchronous>, transform_indices = @transform_2, window_bounds = array<i64: 128, 32>}, {pipeline_mode = #tpu.pipeline_mode<synchronous>, transform_indices = @transform_3, window_bounds = array<i64: 128, 32>}, {pipeline_mode = #tpu.pipeline_mode<synchronous>, transform_indices = @transform_4, window_bounds = array<i64: 1, 32>}, {transform_indices = @transform_5, window_bounds = array<i64: 8, 32>}, {transform_indices = @transform_6, window_bounds = array<i64: 8, 32>}, {transform_indices = @transform_7, window_bounds = array<i64: 8, 128>}]} {
    %c0 = arith.constant 0 : index
    %c0_0 = arith.constant 0 : index
    %0 = vector.load %arg5[%c0, %c0_0] : memref<1x32xf32, #tpu.memory_space<vmem>>, vector<1x32xf32>
    %c0_1 = arith.constant 0 : index
    %c0_2 = arith.constant 0 : index
    %1 = vector.load %arg1[%c0_1, %c0_2] : memref<8x128xf32, #tpu.memory_space<vmem>>, vector<8x128xf32>
    %c0_3 = arith.constant 0 : index
    %c0_4 = arith.constant 0 : index
    %2 = vector.load %arg3[%c0_3, %c0_4] : memref<128x32xf32, #tpu.memory_space<vmem>>, vector<128x32xf32>
    %cst = arith.constant dense<0.000000e+00> : vector<8x32xf32>
    %3 = tpu.matmul %1, %2, %cst {dimension_numbers = #tpu.dot_dimension_numbers<[1], [0], [0], [1], [0, 0, 1, 1], [], []>} : vector<8x128xf32>, vector<128x32xf32>, vector<8x32xf32> -> vector<8x32xf32>
    %4 = vector.broadcast %0 : vector<1x32xf32> to vector<8x32xf32>
    %5 = arith.addf %3, %4 : vector<8x32xf32>
    %c0_5 = arith.constant 0 : index
    %c0_6 = arith.constant 0 : index
    %6 = vector.load %arg2[%c0_5, %c0_6] : memref<8x128xf32, #tpu.memory_space<vmem>>, vector<8x128xf32>
    %c0_7 = arith.constant 0 : index
    %c0_8 = arith.constant 0 : index
    %7 = vector.load %arg4[%c0_7, %c0_8] : memref<128x32xf32, #tpu.memory_space<vmem>>, vector<128x32xf32>
    %cst_9 = arith.constant dense<0.000000e+00> : vector<8x32xf32>
    %8 = tpu.matmul %6, %7, %cst_9 {dimension_numbers = #tpu.dot_dimension_numbers<[1], [0], [0], [1], [0, 0, 1, 1], [], []>} : vector<8x128xf32>, vector<128x32xf32>, vector<8x32xf32> -> vector<8x32xf32>
    %9 = vector.broadcast %0 : vector<1x32xf32> to vector<8x32xf32>
    %10 = arith.addf %8, %9 : vector<8x32xf32>
    %c0_10 = arith.constant 0 : index
    %c0_11 = arith.constant 0 : index
    %11 = vector.load %arg6[%c0_10, %c0_11] : memref<8x32xf32, #tpu.memory_space<vmem>>, vector<8x32xf32>
    tpu.vector_store %arg6[%c0_10, %c0_11], %5 {strides = array<i32>} : memref<8x32xf32, #tpu.memory_space<vmem>>, vector<8x32xf32>,
    %c0_12 = arith.constant 0 : index
    %c0_13 = arith.constant 0 : index
    %12 = vector.load %arg7[%c0_12, %c0_13] : memref<8x32xf32, #tpu.memory_space<vmem>>, vector<8x32xf32>
    tpu.vector_store %arg7[%c0_12, %c0_13], %10 {strides = array<i32>} : memref<8x32xf32, #tpu.memory_space<vmem>>, vector<8x32xf32>,
    %cst_14 = arith.constant dense<0xFF800000> : vector<8xf32>
    %13 = vector.multi_reduction <maximumf>, %5, %cst_14 [1] : vector<8x32xf32> to vector<8xf32>
    %14 = vector.shape_cast %13 : vector<8xf32> to vector<8x1xf32>
    %15 = vector.broadcast %14 : vector<8x1xf32> to vector<8x32xf32>
    %16 = arith.subf %5, %15 : vector<8x32xf32>
    %17 = math.exp %16 : vector<8x32xf32>
    %cst_15 = arith.constant dense<0.000000e+00> : vector<8xf32>
    %18 = vector.multi_reduction <add>, %17, %cst_15 [1] : vector<8x32xf32> to vector<8xf32>
    %19 = vector.shape_cast %18 : vector<8xf32> to vector<8x1xf32>
    %20 = tpu.reciprocal %19 {approx = true} : vector<8x1xf32> -> vector<8x1xf32>
    %21 = vector.broadcast %20 : vector<8x1xf32> to vector<8x32xf32>
    %22 = arith.mulf %17, %21 : vector<8x32xf32>
    %23 = math.log %19 : vector<8x1xf32>
    %24 = vector.broadcast %23 : vector<8x1xf32> to vector<8x32xf32>
    %25 = arith.subf %16, %24 : vector<8x32xf32>
    %cst_16 = arith.constant dense<0xFF800000> : vector<8xf32>
    %26 = vector.multi_reduction <maximumf>, %10, %cst_16 [1] : vector<8x32xf32> to vector<8xf32>
    %27 = vector.shape_cast %26 : vector<8xf32> to vector<8x1xf32>
    %28 = vector.broadcast %27 : vector<8x1xf32> to vector<8x32xf32>
    %29 = arith.subf %10, %28 : vector<8x32xf32>
    %30 = math.exp %29 : vector<8x32xf32>
    %cst_17 = arith.constant dense<0.000000e+00> : vector<8xf32>
    %31 = vector.multi_reduction <add>, %30, %cst_17 [1] : vector<8x32xf32> to vector<8xf32>
    %32 = vector.shape_cast %31 : vector<8xf32> to vector<8x1xf32>
    %33 = tpu.reciprocal %32 {approx = true} : vector<8x1xf32> -> vector<8x1xf32>
    %34 = vector.broadcast %33 : vector<8x1xf32> to vector<8x32xf32>
    %35 = arith.mulf %30, %34 : vector<8x32xf32>
    %36 = math.log %32 : vector<8x1xf32>
    %37 = vector.broadcast %36 : vector<8x1xf32> to vector<8x32xf32>
    %38 = arith.subf %29, %37 : vector<8x32xf32>
    %39 = arith.subf %22, %35 : vector<8x32xf32>
    %40 = arith.subf %25, %38 : vector<8x32xf32>
    %41 = arith.mulf %39, %40 : vector<8x32xf32>
    %42 = vector.shape_cast %41 : vector<8x32xf32> to vector<1x8x32xf32>
    %cst_18 = arith.constant dense<0.000000e+00> : vector<1xf32>
    %43 = vector.multi_reduction <add>, %42, %cst_18 [1, 2] : vector<1x8x32xf32> to vector<1xf32>
    %44 = vector.shape_cast %43 : vector<1xf32> to vector<1x1x1xf32>
    %45 = vector.extract %44[0, 0, 0] : f32 from vector<1x1x1xf32>
    %46 = vector.broadcast %45 : f32 to vector<1x1xf32>
    %47 = vector.shape_cast %46 : vector<1x1xf32> to vector<1x1xf32>
    %48 = vector.broadcast %47 : vector<1x1xf32> to vector<8x128xf32>
    %c0_19 = arith.constant 0 : index
    %c0_20 = arith.constant 0 : index
    %49 = vector.load %arg8[%c0_19, %c0_20] : memref<8x128xf32, #tpu.memory_space<vmem>>, vector<8x128xf32>
    tpu.vector_store %arg8[%c0_19, %c0_20], %48 {strides = array<i32>} : memref<8x128xf32, #tpu.memory_space<vmem>>, vector<8x128xf32>,
    return
  }
  func.func @transform_0(%arg0: i32) -> (i32, i32) {
    %c0_i32 = arith.constant 0 : i32
    %c0_i32_0 = arith.constant 0 : i32
    return %arg0, %c0_i32 : i32, i32
  }
  func.func @transform_1(%arg0: i32) -> (i32, i32) {
    %c0_i32 = arith.constant 0 : i32
    %c0_i32_0 = arith.constant 0 : i32
    return %arg0, %c0_i32 : i32, i32
  }
  func.func @transform_2(%arg0: i32) -> (i32, i32) {
    %c0_i32 = arith.constant 0 : i32
    %c0_i32_0 = arith.constant 0 : i32
    %c0_i32_1 = arith.constant 0 : i32
    return %c0_i32, %c0_i32_0 : i32, i32
  }
  func.func @transform_3(%arg0: i32) -> (i32, i32) {
    %c0_i32 = arith.constant 0 : i32
    %c0_i32_0 = arith.constant 0 : i32
    %c0_i32_1 = arith.constant 0 : i32
    return %c0_i32, %c0_i32_0 : i32, i32
  }
  func.func @transform_4(%arg0: i32) -> (i32, i32) {
    %c0_i32 = arith.constant 0 : i32
    %c0_i32_0 = arith.constant 0 : i32
    %c0_i32_1 = arith.constant 0 : i32
    return %c0_i32, %c0_i32_0 : i32, i32
  }
  func.func @transform_5(%arg0: i32) -> (i32, i32) {
    %c0_i32 = arith.constant 0 : i32
    %c0_i32_0 = arith.constant 0 : i32
    return %arg0, %c0_i32 : i32, i32
  }
  func.func @transform_6(%arg0: i32) -> (i32, i32) {
    %c0_i32 = arith.constant 0 : i32
    %c0_i32_0 = arith.constant 0 : i32
    return %arg0, %c0_i32 : i32, i32
  }
  func.func @transform_7(%arg0: i32) -> (i32, i32) {
    %c0_i32 = arith.constant 0 : i32
    %c0_i32_0 = arith.constant 0 : i32
    return %arg0, %c0_i32 : i32, i32
  }
}

</mosaic_0001>

<bundles_post_ra>
// kernel: tpu_custom_call.1
= control target key start
LH: loop header
LB: loop body
LE: loop exit
PB: predicated region body
PF: predicated region fallthrough
CT: control target
= control target key end

     0   :  { %13 = vsyncpa [#allocation3], 0  ;;  %v536_v3 = vmov 0.0|0.0   ;;  %vm537_vm0 = vmmov 0   ;;  %v538_v11 = vmov 0.0   ;;  %s746_s0 = inlined_call_operand.vmem [shape: f32[8,128], index: 0, kind: input, shape index: {}]   ;;  %s747_s1 = inlined_call_operand.vmem [shape: f32[8,128], index: 1, kind: input, shape index: {}]   ;;  %s748_s2 = inlined_call_operand.vmem [shape: f32[128,32], index: 2, kind: input, shape index: {}]   ;;  %s749_s3 = inlined_call_operand.vmem [shape: f32[128,32], index: 3, kind: input, shape index: {}]   ;;  %s750_s4 = inlined_call_operand.vmem [shape: f32[1,32], index: 4, kind: input, shape index: {}]   ;;  %s751_s5 = inlined_call_operand.hbm [shape: f32[8,32], index: 5, kind: output, shape index: {0}]   ;;  %s752_s6 = inlined_call_operand.hbm [shape: f32[8,32], index: 6, kind: output, shape index: {1}]   ;;  %s753_s7 = inlined_call_operand.hbm [shape: f32[8,128], index: 7, kind: output, shape index: {2}]  }
   0x1   :  { %v27_v0 = vld [vmem:[%s748_s2] sm:$0xff]  ;;  %v28_v1 = vld [vmem:[%s748_s2 + $0x8] sm:$0xff]  ;;  %398 = vmatprep.subr.bf16.mxu0 %v536_v3  ;;  %422 = vmatprep.subr.bf16.mxu1 %v536_v3  ;;  %v29_v6 = vld [vmem:[%s748_s2 + $0x10] sm:$0xff] }
   0x2   :  { %v120_v2 = vld [vmem:[%s749_s3] sm:$0xff]  ;;  %v399_v4 = vpack.c.bf16 %v28_v1, %v27_v0  ;;  %v121_v5 = vld [vmem:[%s749_s3 + $0x8] sm:$0xff]  ;;  %v30_v7 = vld [vmem:[%s748_s2 + $0x18] sm:$0xff]  ;;  %360 = vmatprep.mubr.msk.f32.mxu0 %vm537_vm0, %v538_v11  ;;  %395 = vmatprep.mubr.msk.f32.mxu1 %vm537_vm0, %v538_v11 }
   0x3   :  { %v423_v8 = vpack.c.bf16 %v121_v5, %v120_v2  ;;  %v122_v9 = vld [vmem:[%s749_s3 + $0x10] sm:$0xff]  ;;  %v123_v10 = vld [vmem:[%s749_s3 + $0x18] sm:$0xff]  ;;  %v402_v12 = vpack.c.bf16 %v30_v7, %v29_v6  ;;  %v31_v14 = vld [vmem:[%s748_s2 + $0x20] sm:$0xff] }
   0x4   :  { %400 = vmatpush3.bf16.msra.mxu0 %v399_v4  ;;  %v426_v13 = vpack.c.bf16 %v123_v10, %v122_v9  ;;  %v32_v15 = vld [vmem:[%s748_s2 + $0x28] sm:$0xff]  ;;  %v124_v16 = vld [vmem:[%s749_s3 + $0x20] sm:$0xff]  ;;  %v33_v20 = vld [vmem:[%s748_s2 + $0x30] sm:$0xff] }
   0x5   :  { %401 = vmatprep.subr.bf16.mxu0 %v536_v3  ;;  %424 = vmatpush3.bf16.msra.mxu1 %v423_v8  ;;  %v125_v17 = vld [vmem:[%s749_s3 + $0x28] sm:$0xff]  ;;  %v405_v18 = vpack.c.bf16 %v32_v15, %v31_v14  ;;  %v34_v21 = vld [vmem:[%s748_s2 + $0x38] sm:$0xff]  ;;  %v126_v22 = vld [vmem:[%s749_s3 + $0x30] sm:$0xff] }
   0x6   :  { %425 = vmatprep.subr.bf16.mxu1 %v536_v3  ;;  %v429_v19 = vpack.c.bf16 %v125_v17, %v124_v16  ;;  %v127_v23 = vld [vmem:[%s749_s3 + $0x38] sm:$0xff]  ;;  %v408_v24 = vpack.c.bf16 %v34_v21, %v33_v20 }
   0x8   :  { %403 = vmatpush3.bf16.msra.mxu0 %v402_v12 }
   0x9   :  { %404 = vmatprep.subr.bf16.mxu0 %v536_v3  ;;  %427 = vmatpush3.bf16.msra.mxu1 %v426_v13 }
   0xa   :  { %428 = vmatprep.subr.bf16.mxu1 %v536_v3 }
   0xc   :  { %406 = vmatpush3.bf16.msra.mxu0 %v405_v18 }
   0xd   :  { %14 = vsyncpa [#allocation5], 0  ;;  %407 = vmatprep.subr.bf16.mxu0 %v536_v3  ;;  %430 = vmatpush3.bf16.msra.mxu1 %v429_v19  ;;  %v432_v25 = vpack.c.bf16 %v127_v23, %v126_v22  ;;  %v35_v26 = vld [vmem:[%s748_s2 + $0x40] sm:$0xff]  ;;  %v36_v27 = vld [vmem:[%s748_s2 + $0x48] sm:$0xff]  ;;  %vm206_vm1 = vcmask 261120  }
   0xe   :  { %431 = vmatprep.subr.bf16.mxu1 %v536_v3  ;;  %v128_v28 = vld [vmem:[%s749_s3 + $0x40] sm:$0xff]  ;;  %v129_v29 = vld [vmem:[%s749_s3 + $0x48] sm:$0xff]  ;;  %v411_v30 = vpack.c.bf16 %v36_v27, %v35_v26  ;;  %v37_v32 = vld [vmem:[%s748_s2 + $0x50] sm:$0xff] }
   0xf   :  { %v435_v31 = vpack.c.bf16 %v129_v29, %v128_v28  ;;  %v38_v33 = vld [vmem:[%s748_s2 + $0x58] sm:$0xff]  ;;  %v130_v34 = vld [vmem:[%s749_s3 + $0x50] sm:$0xff]  ;;  %v39_v38 = vld [vmem:[%s748_s2 + $0x60] sm:$0xff] }
  0x10   :  { %409 = vmatpush3.bf16.msra.mxu0 %v408_v24  ;;  %v131_v35 = vld [vmem:[%s749_s3 + $0x58] sm:$0xff]  ;;  %v414_v36 = vpack.c.bf16 %v38_v33, %v37_v32  ;;  %v40_v39 = vld [vmem:[%s748_s2 + $0x68] sm:$0xff]  ;;  %v132_v40 = vld [vmem:[%s749_s3 + $0x60] sm:$0xff] }
  0x11   :  { %410 = vmatprep.subr.bf16.mxu0 %v536_v3  ;;  %433 = vmatpush3.bf16.msra.mxu1 %v432_v25  ;;  %v438_v37 = vpack.c.bf16 %v131_v35, %v130_v34  ;;  %v133_v41 = vld [vmem:[%s749_s3 + $0x68] sm:$0xff]  ;;  %v417_v42 = vpack.c.bf16 %v40_v39, %v39_v38  ;;  %v41_v44 = vld [vmem:[%s748_s2 + $0x70] sm:$0xff]  ;;  %v42_v45 = vld [vmem:[%s748_s2 + $0x78] sm:$0xff] }
  0x12   :  { %434 = vmatprep.subr.bf16.mxu1 %v536_v3  ;;  %v441_v43 = vpack.c.bf16 %v133_v41, %v132_v40  ;;  %v134_v46 = vld [vmem:[%s749_s3 + $0x70] sm:$0xff]  ;;  %v135_v47 = vld [vmem:[%s749_s3 + $0x78] sm:$0xff]  ;;  %v420_v48 = vpack.c.bf16 %v42_v45, %v41_v44  ;;  %v26_v50 = vld [vmem:[%s746_s0] sm:$0xff]  ;;  %s539_s0 = smov [#allocation4]  }
  0x13   :  { %v444_v49 = vpack.c.bf16 %v135_v47, %v134_v46  ;;  %v119_v51 = vld [vmem:[%s747_s1] sm:$0xff]  ;;  %s268_s1 = sshll.u32 %s539_s0, 4  ;;  %s269_s1 = int_to_ptr.vmem [resolvable:$true] %s268_s1 }
  0x14   :  { %412 = vmatpush3.bf16.msra.mxu0 %v411_v30  ;;  %v293_v52 = vld [vmem:[%s750_s4] ss:$0 sm:$0xff]  ;;  %s540_s4 = smov [#allocation2]   ;;  %s466_s24 = scalar_lea.vmem %s269_s1, 128 }
  0x15   :  { %413 = vmatprep.subr.bf16.mxu0 %v536_v3  ;;  %436 = vmatpush3.bf16.msra.mxu1 %v435_v31  ;;  %s258_s23 = sshll.u32 %s540_s4, 4  ;;  %p467_p0 = scmp.ne.s32.totalorder %s269_s1, %s466_s24  ;;  %s259_s23 = int_to_ptr.vmem [resolvable:$true] %s258_s23 }
  0x16   :  { %437 = vmatprep.subr.bf16.mxu1 %v536_v3  ;;  %p471_p1 = scmp.lt.s32.totalorder %s269_s1, %s269_s1  ;;  %p472_p2 = scmp.lt.s32.totalorder %s466_s24, %s466_s24 }
  0x18   :  { %415 = vmatpush3.bf16.msra.mxu0 %v414_v36  ;;  %p473_p3 = por %p472_p2, %p471_p1 }
  0x19   :  { %416 = vmatprep.subr.bf16.mxu0 %v536_v3  ;;  %439 = vmatpush3.bf16.msra.mxu1 %v438_v37 }
  0x1a   :  { %440 = vmatprep.subr.bf16.mxu1 %v536_v3  ;;  %p474_p4 = pnand %p473_p3, %p467_p0 }
  0x1c   :  { %418 = vmatpush3.bf16.msra.mxu0 %v417_v42 }
  0x1d   :  { %419 = vmatprep.subr.bf16.mxu0 %v536_v3  ;;  %442 = vmatpush3.bf16.msra.mxu1 %v441_v43 }
  0x1e   :  { %443 = vmatprep.subr.bf16.mxu1 %v536_v3 }
  0x20   :  { %421 = vmatpush3.bf16.msra.mxu0 %v420_v48 }
  0x21   :  { %445 = vmatpush3.bf16.msra.mxu1 %v444_v49 }
  0x23   :  { %361 = vmatmul.mubr.f32.vlgmr.msra.gmra.mrb[0].mxu0 %v26_v50 }
  0x24   :  { %396 = vmatmul.mubr.f32.vlgmr.msra.gmra.mrb[0].mxu1 %v119_v51 }
  0xf6   :  { %v115_v53 = vpop.f32.mrb[0].mxu0 }
  0xf7   :  { %v116_v54 = vadd.f32 %v293_v52, %v115_v53  ;;  %v362_v55 = vpop.f32.mrb[1].mxu0  ;;  %v202_v56 = vpop.f32.mrb[0].mxu1 }
  0xf8   :  { %v203_v57 = vadd.f32 %v293_v52, %v202_v56  ;;  %v397_v58 = vpop.f32.mrb[1].mxu1 }
  0xf9   :  { %v209_v59 = vsel %vm206_vm1, %v116_v54, -inf  ;;  %207 = vst.msk [vmem:[#allocation2] sm:$0xff] %vm206_vm1, %v116_v54 }
  0xfa   :  { %210 = vmax.xlane.f32.xlu0 %v209_v59  ;;  %208 = vst.msk [vmem:[#allocation4] sm:$0xff] %vm206_vm1, %v203_v57  ;;  %v223_v60 = vsel %vm206_vm1, %v203_v57, -inf }
  0xfe   :  { %224 = vmax.xlane.f32.xlu0 %v223_v60 }
 0x187   :  { %v211_v61 = vpop.xlane.xlu0 %210 }
 0x188   :  { %v212_v62 = vsub.f32 %v116_v54, %v211_v61 }
 0x18a   :  { %v213_v63 = vmul.f32 1.442695, %v212_v62 }
 0x18b   :  { %v225_v0 = vpop.xlane.xlu0 %224 }
 0x18c   :  { %454 = vpow2.f32 %v213_v63  ;;  %v226_v1 = vsub.f32 %v203_v57, %v225_v0 }
 0x18e   :  { %v227_v2 = vmul.f32 1.442695, %v226_v1 }
 0x190   :  { %456 = vpow2.f32 %v227_v2 }
 0x196   :  { %v455_v3 = vpop.eup %454 }
 0x197   :  { %v215_v4 = vsel %vm206_vm1, %v455_v3, 0.0 }
 0x198   :  { %216 = vadd.xlane.f32.xlu1 %v215_v4 }
 0x19a   :  { %v457_v5 = vpop.eup %456 }
 0x19b   :  { %v229_v6 = vsel %vm206_vm1, %v457_v5, 0.0 }
 0x19c   :  { %230 = vadd.xlane.f32.xlu1 %v229_v6 }
 0x225   :  { %v217_v7 = vpop.xlane.xlu1 %216 }
 0x226   :  { %458 = vlog2.f32 %v217_v7 }
 0x227   :  { %460 = vrcp.f32 %v217_v7 }
 0x229   :  { %v231_v8 = vpop.xlane.xlu1 %230 }
 0x22a   :  { %462 = vrcp.f32 %v231_v8 }
 0x22b   :  { %464 = vlog2.f32 %v231_v8 }
 0x230   :  { %v459_v9 = vpop.eup %458 }
 0x231   :  { %v461_v10 = vpop.eup %460  ;;  %v221_v12 = vmul.f32 0.6931472, %v459_v9 }
 0x232   :  { %v219_v17 = vmul.f32 %v461_v10, %v455_v3 }
 0x233   :  { %v222_v18 = vsub.f32 %v212_v62, %v221_v12 }
 0x234   :  { %v463_v11 = vpop.eup %462 }
 0x235   :  { %v465_v13 = vpop.eup %464  ;;  %v233_v15 = vmul.f32 %v463_v11, %v457_v5 }
 0x236   :  { %v235_v14 = vmul.f32 0.6931472, %v465_v13 }
 0x237   :  { %v237_v19 = vsub.f32 %v219_v17, %v233_v15 }
 0x238   :  { %v236_v16 = vsub.f32 %v226_v1, %v235_v14 }
 0x23a   :  { %v238_v20 = vsub.f32 %v222_v18, %v236_v16 }
 0x23c   :  { %v239_v21 = vmul.f32 %v238_v20, %v237_v19 }
 0x23e   :  { %v240_v22 = vsel %vm206_vm1, %v239_v21, 0.0 }
 0x23f   :  { %241 = vadd.xlane.f32.xlu0 %v240_v22 }
 0x240   :  { %477 = shalt.err (!%p474_p4)
}
 0x241   :  { %s478_s27 = scalar_lea.hbm %s752_s6, 128 }
 0x242   :  { %p479_p5 = scmp.ne.s32.totalorder %s752_s6, %s478_s27  ;;  %p482_p6 = scmp.lt.u32.totalorder %s478_s27, %s752_s6 }
 0x244   :  { %p484_p7 = pnand %p482_p6, %p479_p5 }
 0x246   :  { %487 = shalt.err (!%p484_p7)
}
 0x247   :  { %271 = dma.vmem_to_hbm [thread:$0]  %s269_s1, 128, %s752_s6, [#allocation5]  }
 0x248   :  { %s488_s11 = scalar_lea.vmem %s259_s23, 128  ;;  %p493_p9 = scmp.lt.s32.totalorder %s259_s23, %s259_s23 }
 0x249   :  { %p489_p8 = scmp.ne.s32.totalorder %s259_s23, %s488_s11  ;;  %p494_p10 = scmp.lt.s32.totalorder %s488_s11, %s488_s11 }
 0x24b   :  { %p495_p11 = por %p494_p10, %p493_p9 }
 0x24d   :  { %p496_p12 = pnand %p495_p11, %p489_p8 }
 0x24f   :  { %499 = shalt.err (!%p496_p12)
}
 0x250   :  { %s500_s14 = scalar_lea.hbm %s751_s5, 128 }
 0x251   :  { %p501_p13 = scmp.ne.s32.totalorder %s751_s5, %s500_s14  ;;  %p504_p0 = scmp.lt.u32.totalorder %s500_s14, %s751_s5 }
 0x253   :  { %p506_p1 = pnand %p504_p0, %p501_p13 }
 0x255   :  { %509 = shalt.err (!%p506_p1)
}
 0x256   :  { %261 = dma.vmem_to_hbm [thread:$0]  %s259_s23, 128, %s751_s5, [#allocation3]  }
 0x257   :  { %s541_s19 = smov [#allocation6]  }
 0x258   :  { %s278_s20 = sshll.u32 %s541_s19, 4  ;;  %s279_s20 = int_to_ptr.vmem [resolvable:$true] %s278_s20 }
 0x259   :  { %s510_s3 = scalar_lea.vmem %s279_s20, 128  ;;  %p515_p3 = scmp.lt.s32.totalorder %s279_s20, %s279_s20 }
 0x25a   :  { %p511_p2 = scmp.ne.s32.totalorder %s279_s20, %s510_s3  ;;  %p516_p4 = scmp.lt.s32.totalorder %s510_s3, %s510_s3 }
 0x25c   :  { %p517_p5 = por %p516_p4, %p515_p3 }
 0x25e   :  { %p518_p6 = pnand %p517_p5, %p511_p2 }
 0x2cc   :  { %v242_v23 = vpop.xlane.xlu0 %241 }
 0x2cd   :  { %v243_v24 = vrot.slane %v242_v23, 4 }
 0x2cf   :  { %v244_v25 = vadd.f32 %v243_v24, %v242_v23 }
 0x2d1   :  { %v245_v26 = vrot.slane %v244_v25, 2 }
 0x2d3   :  { %v246_v27 = vadd.f32 %v245_v26, %v244_v25 }
 0x2d5   :  { %v247_v28 = vrot.slane %v246_v27, 1 }
 0x2d7   :  { %v248_v29 = vadd.f32 %v247_v28, %v246_v27 }
 0x2d9   :  { %446 = vpush %v248_v29 }
 0x30a   :  { %s447_s21 = spop %446 }
 0x30b   :  { %v250_v30 = vstv %s447_s21 }
 0x30c   :  { %251 = vst [vmem:[#allocation6] sm:$0xff] %v250_v30 }
 0x30d   :  { %521 = shalt.err (!%p518_p6)
}
 0x30e   :  { %s522_s0 = scalar_lea.hbm %s753_s7, 128 }
 0x30f   :  { %p523_p7 = scmp.ne.s32.totalorder %s753_s7, %s522_s0  ;;  %p526_p8 = scmp.lt.u32.totalorder %s522_s0, %s753_s7 }
 0x311   :  { %p528_p9 = pnand %p526_p8, %p523_p7 }
 0x313   :  { %531 = shalt.err (!%p528_p9)
}
 0x314   :  { %281 = dma.vmem_to_hbm [thread:$0]  %s279_s20, 128, %s753_s7, [#allocation5]  }
 0x315   :  { %532 = dma.done.wait [#allocation3], 128  }
 0x316   :  { %533 = vsyncadd [#allocation3], 4294967168 }
 0x317   :  { %534 = dma.done.wait [#allocation5], 256  }
 0x318   :  { %535 = vsyncadd [#allocation5], 4294967040 }
 0x319   :  { %291 = vsyncpa [#allocation3], 1 }
 0x31a   :  { %292 = vsyncpa [#allocation5], 1 }

</bundles_post_ra>
